<compile_context>
chip_gen: v5e
topology: v5e:2x2
jax: 0.10.0
libtpu: 0.0.40
codegen_flags: <defaults>
</compile_context>

<pallas_src>
import functools
import math

import jax
import jax.numpy as jnp
from jax import lax
from jax.experimental import pallas as pl
from jax.experimental.pallas import tpu as pltpu


# ----------------------------------------------------------------------------
# Deterministic parameter init (gaussian orthogonal random matrix, scaling=0)
# ----------------------------------------------------------------------------
def _orthogonal_chunk(key, cols):
    block = jax.random.normal(key, (cols, cols), dtype=jnp.float32)
    q, _ = jnp.linalg.qr(block)
    return q.T


def gaussian_orthogonal_random_matrix(key, nb_rows, nb_cols, scaling=0):
    nb_full_blocks = nb_rows // nb_cols
    keys = jax.random.split(key, nb_full_blocks + 2)
    blocks = [_orthogonal_chunk(keys[i], nb_cols) for i in range(nb_full_blocks)]
    remaining = nb_rows - nb_full_blocks * nb_cols
    if remaining > 0:
        blocks.append(_orthogonal_chunk(keys[nb_full_blocks], nb_cols)[:remaining])
    final = jnp.concatenate(blocks, axis=0)  # (nb_rows, nb_cols)
    if scaling == 0:
        mult = jnp.linalg.norm(
            jax.random.normal(keys[-1], (nb_rows, nb_cols), dtype=jnp.float32), axis=1
        )
    elif scaling == 1:
        mult = math.sqrt(float(nb_cols)) * jnp.ones((nb_rows,), jnp.float32)
    else:
        raise ValueError(f"Invalid scaling {scaling}")
    return mult[:, None] * final  # diag(mult) @ final


# ----------------------------------------------------------------------------
# Pallas kernel: softmax feature map + linear attention for G heads per step
# ----------------------------------------------------------------------------
def enla_kernel(q_ref, k_ref, v_ref, projt_ref, o_ref, *, ratio, eps, nb_features):
    G, N, D = q_ref.shape
    E_aug = v_ref.shape[-1]      # E + 1 (ones column appended by the wrapper)
    E = E_aug - 1
    Mp = projt_ref.shape[-1]     # padded feature count (multiple of 128)

    projt = projt_ref[...]                                   # (D, Mp)

    # ---- softmax feature map, fused across the G heads (one big MXU matmul) --
    q2 = q_ref[...].reshape(G * N, D)                         # native dtype
    k2 = k_ref[...].reshape(G * N, D)
    q_dash = jnp.dot(q2, projt, preferred_element_type=jnp.float32)   # (G*N, Mp)
    k_dash = jnp.dot(k2, projt, preferred_element_type=jnp.float32)   # (G*N, Mp)

    qf = q2.astype(jnp.float32)
    kf = k2.astype(jnp.float32)
    q_diag = 0.5 * jnp.sum(qf * qf, axis=-1, keepdims=True)            # (G*N, 1)
    k_diag = 0.5 * jnp.sum(kf * kf, axis=-1, keepdims=True)

    q_prime = ratio * (jnp.exp(q_dash - q_diag) + eps)                 # (G*N, Mp)
    k_prime = ratio * (jnp.exp(k_dash - k_diag) + eps)                 # (G*N, Mp)

    # Zero the padded feature columns of k_prime (exp(0 - diag) + eps != 0).
    # Masking k_prime alone is sufficient for correctness (see header comment).
    feat_mask = lax.broadcasted_iota(jnp.int32, (1, Mp), 1) < nb_features
    k_prime = k_prime * feat_mask.astype(jnp.float32)

    # ---- linear attention with fused denominator, per head (static unroll) ---
    for g in range(G):
        qp = q_prime[g * N:(g + 1) * N, :]                    # (N, Mp)
        kp = k_prime[g * N:(g + 1) * N, :]                    # (N, Mp)
        vg = v_ref[g].astype(jnp.float32)                     # (N, E+1), last col = 1
        ctx = jnp.dot(kp.T, vg, preferred_element_type=jnp.float32)    # (Mp, E+1)
        oa = jnp.dot(qp, ctx, preferred_element_type=jnp.float32)      # (N, E+1)
        num = oa[:, :E]                                       # (N, E)
        den = oa[:, E:]                                       # (N, 1) = q' . k_cumsum
        og = num * pl.reciprocal(den, approx=False)           # exact reciprocal
        # lane-dense (N, G*E) output slab; head g occupies lanes [g*E, (g+1)*E)
        o_ref[0, :, g * E:(g + 1) * E] = og.astype(o_ref.dtype)


# ----------------------------------------------------------------------------
# Wrapper
# ----------------------------------------------------------------------------
def enla_forward(q, k, v, projection_matrix, *, eps=1e-4):
    B, H, N, D = q.shape
    E = v.shape[-1]
    M = projection_matrix.shape[0]
    ratio = float(M) ** -0.5
    BH = B * H

    # Heads per grid step: aim for a lane-dense (>= 128 wide) output slab.
    target = max(1, -(-128 // E))          # ceil(128 / E)
    G = 1
    for cand in range(1, min(BH, target) + 1):
        if BH % cand == 0:
            G = cand

    # Pre-transposed, 128-padded projection in the input dtype (bf16-friendly).
    Mp = ((M + 127) // 128) * 128
    proj_t = jnp.zeros((D, Mp), q.dtype).at[:, :M].set(
        projection_matrix.T.astype(q.dtype)
    )

    qf = q.reshape(BH, N, D)
    kf = k.reshape(BH, N, D)
    # Append a ones column so the denominator rides the output matmul.
    vf = jnp.concatenate(
        [v.reshape(BH, N, E), jnp.ones((BH, N, 1), v.dtype)], axis=-1
    )

    kernel = functools.partial(enla_kernel, ratio=ratio, eps=eps, nb_features=M)

    out = pl.pallas_call(
        kernel,
        out_shape=jax.ShapeDtypeStruct((BH // G, N, G * E), q.dtype),
        grid_spec=pltpu.PrefetchScalarGridSpec(
            num_scalar_prefetch=0,
            grid=(BH // G,),
            in_specs=[
                pl.BlockSpec((G, N, D), lambda i: (i, 0, 0)),
                pl.BlockSpec((G, N, D), lambda i: (i, 0, 0)),
                pl.BlockSpec((G, N, E + 1), lambda i: (i, 0, 0)),
                pl.BlockSpec((D, Mp), lambda i: (0, 0)),
            ],
            out_specs=pl.BlockSpec((1, N, G * E), lambda i: (i, 0, 0)),
        ),
        compiler_params=pltpu.CompilerParams(dimension_semantics=("parallel",)),
    )(qf, kf, vf, proj_t)

    # (BH//G, N, G*E) -> (B, H, N, E)
    out = out.reshape(BH // G, N, G, E).transpose(0, 2, 1, 3)
    return out.reshape(B, H, N, E)


# Pure-JAX reference for correctness checking
def enla_reference(q, k, v, proj, *, eps=1e-4):
    ratio = proj.shape[0] ** -0.5

    def feat(x):
        dash = jnp.einsum("bhid,jd->bhij", x, proj)
        diag = 0.5 * jnp.sum(x * x, axis=-1, keepdims=True)
        return ratio * (jnp.exp(dash - diag) + eps)

    qp, kp = feat(q), feat(k)
    k_cumsum = kp.sum(axis=-2)
    d_inv = 1.0 / jnp.einsum("bhnd,bhd->bhn", qp, k_cumsum)
    context = jnp.einsum("bhnd,bhne->bhde", kp, v)
    return jnp.einsum("bhde,bhnd,bhn->bhne", context, qp, d_inv)


if __name__ == "__main__":
    # Small shapes consistent with the module: dim_heads=32, seq=8, batch=2, heads=2
    B, H, N = 2, 2, 8
    dim_heads = 32
    nb_features = int(dim_heads * math.log(dim_heads))  # default from __init__ -> 110

    key = jax.random.PRNGKey(0)
    kq, kk, kv, kp = jax.random.split(key, 4)
    q = jax.random.normal(kq, (B, H, N, dim_heads), dtype=jnp.float32)
    k = jax.random.normal(kk, (B, H, N, dim_heads), dtype=jnp.float32)
    v = jax.random.normal(kv, (B, H, N, dim_heads), dtype=jnp.float32)

    projection_matrix = gaussian_orthogonal_random_matrix(
        kp, nb_features, dim_heads, scaling=0
    )

    out = enla_forward(q, k, v, projection_matrix)
    out = jax.block_until_ready(out)

    ref = enla_reference(q, k, v, projection_matrix)
    assert out.shape == (B, H, N, dim_heads)
    assert jnp.allclose(out, ref, rtol=5e-4, atol=1e-5), "mismatch vs reference"

    print("KERNEL_OK")
</pallas_src>

<mosaic_0001>
module attributes {stable_mosaic.version = 11 : i64} {
  func.func @enla_kernel(%arg0: i32, %arg1: memref<4x8x32xf32, #tpu.memory_space<vmem>>, %arg2: memref<4x8x32xf32, #tpu.memory_space<vmem>>, %arg3: memref<4x8x33xf32, #tpu.memory_space<vmem>>, %arg4: memref<32x128xf32, #tpu.memory_space<vmem>>, %arg5: memref<1x8x128xf32, #tpu.memory_space<vmem>>) attributes {dimension_semantics = [#tpu.dimension_semantics<parallel>], iteration_bounds = array<i64: 1>, scalar_prefetch = 0 : i64, scratch_operands = 0 : i64, tpu.core_type = #tpu.core_type<tc>, window_params = [{transform_indices = @transform_0, window_bounds = array<i64: 4, 8, 32>}, {transform_indices = @transform_1, window_bounds = array<i64: 4, 8, 32>}, {transform_indices = @transform_2, window_bounds = array<i64: 4, 8, 33>}, {pipeline_mode = #tpu.pipeline_mode<synchronous>, transform_indices = @transform_3, window_bounds = array<i64: 32, 128>}, {transform_indices = @transform_4, window_bounds = array<i64: 1, 8, 128>}]} {
    %c0 = arith.constant 0 : index
    %c0_0 = arith.constant 0 : index
    %0 = vector.load %arg4[%c0, %c0_0] : memref<32x128xf32, #tpu.memory_space<vmem>>, vector<32x128xf32>
    %c0_1 = arith.constant 0 : index
    %c0_2 = arith.constant 0 : index
    %c0_3 = arith.constant 0 : index
    %1 = vector.load %arg1[%c0_1, %c0_2, %c0_3] : memref<4x8x32xf32, #tpu.memory_space<vmem>>, vector<4x8x32xf32>
    %2 = vector.shape_cast %1 : vector<4x8x32xf32> to vector<32x32xf32>
    %c0_4 = arith.constant 0 : index
    %c0_5 = arith.constant 0 : index
    %c0_6 = arith.constant 0 : index
    %3 = vector.load %arg2[%c0_4, %c0_5, %c0_6] : memref<4x8x32xf32, #tpu.memory_space<vmem>>, vector<4x8x32xf32>
    %4 = vector.shape_cast %3 : vector<4x8x32xf32> to vector<32x32xf32>
    %cst = arith.constant dense<0.000000e+00> : vector<32x128xf32>
    %5 = tpu.matmul %2, %0, %cst {dimension_numbers = #tpu.dot_dimension_numbers<[1], [0], [0], [1], [0, 0, 1, 1], [], []>} : vector<32x32xf32>, vector<32x128xf32>, vector<32x128xf32> -> vector<32x128xf32>
    %cst_7 = arith.constant dense<0.000000e+00> : vector<32x128xf32>
    %6 = tpu.matmul %4, %0, %cst_7 {dimension_numbers = #tpu.dot_dimension_numbers<[1], [0], [0], [1], [0, 0, 1, 1], [], []>} : vector<32x32xf32>, vector<32x128xf32>, vector<32x128xf32> -> vector<32x128xf32>
    %7 = arith.mulf %2, %2 : vector<32x32xf32>
    %cst_8 = arith.constant dense<0.000000e+00> : vector<32xf32>
    %8 = vector.multi_reduction <add>, %7, %cst_8 [1] : vector<32x32xf32> to vector<32xf32>
    %9 = vector.shape_cast %8 : vector<32xf32> to vector<32x1xf32>
    %cst_9 = arith.constant 5.000000e-01 : f32
    %10 = vector.broadcast %cst_9 : f32 to vector<32x1xf32>
    %11 = arith.mulf %10, %9 : vector<32x1xf32>
    %12 = arith.mulf %4, %4 : vector<32x32xf32>
    %cst_10 = arith.constant dense<0.000000e+00> : vector<32xf32>
    %13 = vector.multi_reduction <add>, %12, %cst_10 [1] : vector<32x32xf32> to vector<32xf32>
    %14 = vector.shape_cast %13 : vector<32xf32> to vector<32x1xf32>
    %cst_11 = arith.constant 5.000000e-01 : f32
    %15 = vector.broadcast %cst_11 : f32 to vector<32x1xf32>
    %16 = arith.mulf %15, %14 : vector<32x1xf32>
    %17 = vector.broadcast %11 : vector<32x1xf32> to vector<32x128xf32>
    %18 = arith.subf %5, %17 : vector<32x128xf32>
    %19 = math.exp %18 : vector<32x128xf32>
    %cst_12 = arith.constant 9.99999974E-5 : f32
    %20 = vector.broadcast %cst_12 : f32 to vector<32x128xf32>
    %21 = arith.addf %19, %20 : vector<32x128xf32>
    %cst_13 = arith.constant 0.0953462571 : f32
    %22 = vector.broadcast %cst_13 : f32 to vector<32x128xf32>
    %23 = arith.mulf %22, %21 : vector<32x128xf32>
    %24 = vector.broadcast %16 : vector<32x1xf32> to vector<32x128xf32>
    %25 = arith.subf %6, %24 : vector<32x128xf32>
    %26 = math.exp %25 : vector<32x128xf32>
    %cst_14 = arith.constant 9.99999974E-5 : f32
    %27 = vector.broadcast %cst_14 : f32 to vector<32x128xf32>
    %28 = arith.addf %26, %27 : vector<32x128xf32>
    %cst_15 = arith.constant 0.0953462571 : f32
    %29 = vector.broadcast %cst_15 : f32 to vector<32x128xf32>
    %30 = arith.mulf %29, %28 : vector<32x128xf32>
    %31 = tpu.iota {dimensions = array<i32: 1>} : vector<1x128xi32>
    %c110_i32 = arith.constant 110 : i32
    %32 = vector.broadcast %c110_i32 : i32 to vector<1x128xi32>
    %33 = arith.cmpi slt, %31, %32 : vector<1x128xi32>
    %34 = arith.extui %33 : vector<1x128xi1> to vector<1x128xi32>
    %35 = arith.sitofp %34 : vector<1x128xi32> to vector<1x128xf32>
    %36 = vector.broadcast %35 : vector<1x128xf32> to vector<32x128xf32>
    %37 = arith.mulf %30, %36 : vector<32x128xf32>
    %38 = vector.extract_strided_slice %23 {offsets = [0, 0], sizes = [8, 128], strides = [1, 1]} : vector<32x128xf32> to vector<8x128xf32>
    %39 = vector.extract_strided_slice %37 {offsets = [0, 0], sizes = [8, 128], strides = [1, 1]} : vector<32x128xf32> to vector<8x128xf32>
    %c0_16 = arith.constant 0 : index
    %c0_17 = arith.constant 0 : index
    %c0_18 = arith.constant 0 : index
    %40 = vector.load %arg3[%c0_16, %c0_17, %c0_18] : memref<4x8x33xf32, #tpu.memory_space<vmem>>, vector<1x8x33xf32>
    %41 = vector.shape_cast %40 : vector<1x8x33xf32> to vector<8x33xf32>
    %42 = tpu.transpose %39, [1, 0] : vector<8x128xf32> -> vector<128x8xf32>
    %cst_19 = arith.constant dense<0.000000e+00> : vector<128x33xf32>
    %43 = tpu.matmul %42, %41, %cst_19 {dimension_numbers = #tpu.dot_dimension_numbers<[1], [0], [0], [1], [0, 0, 1, 1], [], []>} : vector<128x8xf32>, vector<8x33xf32>, vector<128x33xf32> -> vector<128x33xf32>
    %cst_20 = arith.constant dense<0.000000e+00> : vector<8x33xf32>
    %44 = tpu.matmul %38, %43, %cst_20 {dimension_numbers = #tpu.dot_dimension_numbers<[1], [0], [0], [1], [0, 0, 1, 1], [], []>} : vector<8x128xf32>, vector<128x33xf32>, vector<8x33xf32> -> vector<8x33xf32>
    %45 = vector.extract_strided_slice %44 {offsets = [0, 0], sizes = [8, 32], strides = [1, 1]} : vector<8x33xf32> to vector<8x32xf32>
    %46 = vector.extract_strided_slice %44 {offsets = [0, 32], sizes = [8, 1], strides = [1, 1]} : vector<8x33xf32> to vector<8x1xf32>
    %47 = tpu.reciprocal %46 : vector<8x1xf32> -> vector<8x1xf32>
    %48 = vector.broadcast %47 : vector<8x1xf32> to vector<8x32xf32>
    %49 = arith.mulf %45, %48 : vector<8x32xf32>
    %c0_21 = arith.constant 0 : index
    %c0_22 = arith.constant 0 : index
    %c0_23 = arith.constant 0 : index
    %50 = vector.load %arg5[%c0_21, %c0_22, %c0_23] : memref<1x8x128xf32, #tpu.memory_space<vmem>>, vector<1x8x32xf32>
    %51 = vector.shape_cast %50 : vector<1x8x32xf32> to vector<8x32xf32>
    %52 = vector.shape_cast %49 : vector<8x32xf32> to vector<1x8x32xf32>
    tpu.vector_store %arg5[%c0_21, %c0_22, %c0_23], %52 {strides = array<i32>} : memref<1x8x128xf32, #tpu.memory_space<vmem>>, vector<1x8x32xf32>,
    %53 = vector.extract_strided_slice %23 {offsets = [8, 0], sizes = [8, 128], strides = [1, 1]} : vector<32x128xf32> to vector<8x128xf32>
    %54 = vector.extract_strided_slice %37 {offsets = [8, 0], sizes = [8, 128], strides = [1, 1]} : vector<32x128xf32> to vector<8x128xf32>
    %c1 = arith.constant 1 : index
    %c0_24 = arith.constant 0 : index
    %c0_25 = arith.constant 0 : index
    %55 = vector.load %arg3[%c1, %c0_24, %c0_25] : memref<4x8x33xf32, #tpu.memory_space<vmem>>, vector<1x8x33xf32>
    %56 = vector.shape_cast %55 : vector<1x8x33xf32> to vector<8x33xf32>
    %57 = tpu.transpose %54, [1, 0] : vector<8x128xf32> -> vector<128x8xf32>
    %cst_26 = arith.constant dense<0.000000e+00> : vector<128x33xf32>
    %58 = tpu.matmul %57, %56, %cst_26 {dimension_numbers = #tpu.dot_dimension_numbers<[1], [0], [0], [1], [0, 0, 1, 1], [], []>} : vector<128x8xf32>, vector<8x33xf32>, vector<128x33xf32> -> vector<128x33xf32>
    %cst_27 = arith.constant dense<0.000000e+00> : vector<8x33xf32>
    %59 = tpu.matmul %53, %58, %cst_27 {dimension_numbers = #tpu.dot_dimension_numbers<[1], [0], [0], [1], [0, 0, 1, 1], [], []>} : vector<8x128xf32>, vector<128x33xf32>, vector<8x33xf32> -> vector<8x33xf32>
    %60 = vector.extract_strided_slice %59 {offsets = [0, 0], sizes = [8, 32], strides = [1, 1]} : vector<8x33xf32> to vector<8x32xf32>
    %61 = vector.extract_strided_slice %59 {offsets = [0, 32], sizes = [8, 1], strides = [1, 1]} : vector<8x33xf32> to vector<8x1xf32>
    %62 = tpu.reciprocal %61 : vector<8x1xf32> -> vector<8x1xf32>
    %63 = vector.broadcast %62 : vector<8x1xf32> to vector<8x32xf32>
    %64 = arith.mulf %60, %63 : vector<8x32xf32>
    %c0_28 = arith.constant 0 : index
    %c0_29 = arith.constant 0 : index
    %c32 = arith.constant 32 : index
    %65 = vector.load %arg5[%c0_28, %c0_29, %c32] : memref<1x8x128xf32, #tpu.memory_space<vmem>>, vector<1x8x32xf32>
    %66 = vector.shape_cast %65 : vector<1x8x32xf32> to vector<8x32xf32>
    %67 = vector.shape_cast %64 : vector<8x32xf32> to vector<1x8x32xf32>
    tpu.vector_store %arg5[%c0_28, %c0_29, %c32], %67 {strides = array<i32>} : memref<1x8x128xf32, #tpu.memory_space<vmem>>, vector<1x8x32xf32>,
    %68 = vector.extract_strided_slice %23 {offsets = [16, 0], sizes = [8, 128], strides = [1, 1]} : vector<32x128xf32> to vector<8x128xf32>
    %69 = vector.extract_strided_slice %37 {offsets = [16, 0], sizes = [8, 128], strides = [1, 1]} : vector<32x128xf32> to vector<8x128xf32>
    %c2 = arith.constant 2 : index
    %c0_30 = arith.constant 0 : index
    %c0_31 = arith.constant 0 : index
    %70 = vector.load %arg3[%c2, %c0_30, %c0_31] : memref<4x8x33xf32, #tpu.memory_space<vmem>>, vector<1x8x33xf32>
    %71 = vector.shape_cast %70 : vector<1x8x33xf32> to vector<8x33xf32>
    %72 = tpu.transpose %69, [1, 0] : vector<8x128xf32> -> vector<128x8xf32>
    %cst_32 = arith.constant dense<0.000000e+00> : vector<128x33xf32>
    %73 = tpu.matmul %72, %71, %cst_32 {dimension_numbers = #tpu.dot_dimension_numbers<[1], [0], [0], [1], [0, 0, 1, 1], [], []>} : vector<128x8xf32>, vector<8x33xf32>, vector<128x33xf32> -> vector<128x33xf32>
    %cst_33 = arith.constant dense<0.000000e+00> : vector<8x33xf32>
    %74 = tpu.matmul %68, %73, %cst_33 {dimension_numbers = #tpu.dot_dimension_numbers<[1], [0], [0], [1], [0, 0, 1, 1], [], []>} : vector<8x128xf32>, vector<128x33xf32>, vector<8x33xf32> -> vector<8x33xf32>
    %75 = vector.extract_strided_slice %74 {offsets = [0, 0], sizes = [8, 32], strides = [1, 1]} : vector<8x33xf32> to vector<8x32xf32>
    %76 = vector.extract_strided_slice %74 {offsets = [0, 32], sizes = [8, 1], strides = [1, 1]} : vector<8x33xf32> to vector<8x1xf32>
    %77 = tpu.reciprocal %76 : vector<8x1xf32> -> vector<8x1xf32>
    %78 = vector.broadcast %77 : vector<8x1xf32> to vector<8x32xf32>
    %79 = arith.mulf %75, %78 : vector<8x32xf32>
    %c0_34 = arith.constant 0 : index
    %c0_35 = arith.constant 0 : index
    %c64 = arith.constant 64 : index
    %80 = vector.load %arg5[%c0_34, %c0_35, %c64] : memref<1x8x128xf32, #tpu.memory_space<vmem>>, vector<1x8x32xf32>
    %81 = vector.shape_cast %80 : vector<1x8x32xf32> to vector<8x32xf32>
    %82 = vector.shape_cast %79 : vector<8x32xf32> to vector<1x8x32xf32>
    tpu.vector_store %arg5[%c0_34, %c0_35, %c64], %82 {strides = array<i32>} : memref<1x8x128xf32, #tpu.memory_space<vmem>>, vector<1x8x32xf32>,
    %83 = vector.extract_strided_slice %23 {offsets = [24, 0], sizes = [8, 128], strides = [1, 1]} : vector<32x128xf32> to vector<8x128xf32>
    %84 = vector.extract_strided_slice %37 {offsets = [24, 0], sizes = [8, 128], strides = [1, 1]} : vector<32x128xf32> to vector<8x128xf32>
    %c3 = arith.constant 3 : index
    %c0_36 = arith.constant 0 : index
    %c0_37 = arith.constant 0 : index
    %85 = vector.load %arg3[%c3, %c0_36, %c0_37] : memref<4x8x33xf32, #tpu.memory_space<vmem>>, vector<1x8x33xf32>
    %86 = vector.shape_cast %85 : vector<1x8x33xf32> to vector<8x33xf32>
    %87 = tpu.transpose %84, [1, 0] : vector<8x128xf32> -> vector<128x8xf32>
    %cst_38 = arith.constant dense<0.000000e+00> : vector<128x33xf32>
    %88 = tpu.matmul %87, %86, %cst_38 {dimension_numbers = #tpu.dot_dimension_numbers<[1], [0], [0], [1], [0, 0, 1, 1], [], []>} : vector<128x8xf32>, vector<8x33xf32>, vector<128x33xf32> -> vector<128x33xf32>
    %cst_39 = arith.constant dense<0.000000e+00> : vector<8x33xf32>
    %89 = tpu.matmul %83, %88, %cst_39 {dimension_numbers = #tpu.dot_dimension_numbers<[1], [0], [0], [1], [0, 0, 1, 1], [], []>} : vector<8x128xf32>, vector<128x33xf32>, vector<8x33xf32> -> vector<8x33xf32>
    %90 = vector.extract_strided_slice %89 {offsets = [0, 0], sizes = [8, 32], strides = [1, 1]} : vector<8x33xf32> to vector<8x32xf32>
    %91 = vector.extract_strided_slice %89 {offsets = [0, 32], sizes = [8, 1], strides = [1, 1]} : vector<8x33xf32> to vector<8x1xf32>
    %92 = tpu.reciprocal %91 : vector<8x1xf32> -> vector<8x1xf32>
    %93 = vector.broadcast %92 : vector<8x1xf32> to vector<8x32xf32>
    %94 = arith.mulf %90, %93 : vector<8x32xf32>
    %c0_40 = arith.constant 0 : index
    %c0_41 = arith.constant 0 : index
    %c96 = arith.constant 96 : index
    %95 = vector.load %arg5[%c0_40, %c0_41, %c96] : memref<1x8x128xf32, #tpu.memory_space<vmem>>, vector<1x8x32xf32>
    %96 = vector.shape_cast %95 : vector<1x8x32xf32> to vector<8x32xf32>
    %97 = vector.shape_cast %94 : vector<8x32xf32> to vector<1x8x32xf32>
    tpu.vector_store %arg5[%c0_40, %c0_41, %c96], %97 {strides = array<i32>} : memref<1x8x128xf32, #tpu.memory_space<vmem>>, vector<1x8x32xf32>,
    return
  }
  func.func @transform_0(%arg0: i32) -> (i32, i32, i32) {
    %c0_i32 = arith.constant 0 : i32
    %c0_i32_0 = arith.constant 0 : i32
    %c0_i32_1 = arith.constant 0 : i32
    return %arg0, %c0_i32, %c0_i32_0 : i32, i32, i32
  }
  func.func @transform_1(%arg0: i32) -> (i32, i32, i32) {
    %c0_i32 = arith.constant 0 : i32
    %c0_i32_0 = arith.constant 0 : i32
    %c0_i32_1 = arith.constant 0 : i32
    return %arg0, %c0_i32, %c0_i32_0 : i32, i32, i32
  }
  func.func @transform_2(%arg0: i32) -> (i32, i32, i32) {
    %c0_i32 = arith.constant 0 : i32
    %c0_i32_0 = arith.constant 0 : i32
    %c0_i32_1 = arith.constant 0 : i32
    return %arg0, %c0_i32, %c0_i32_0 : i32, i32, i32
  }
  func.func @transform_3(%arg0: i32) -> (i32, i32) {
    %c0_i32 = arith.constant 0 : i32
    %c0_i32_0 = arith.constant 0 : i32
    %c0_i32_1 = arith.constant 0 : i32
    return %c0_i32, %c0_i32_0 : i32, i32
  }
  func.func @transform_4(%arg0: i32) -> (i32, i32, i32) {
    %c0_i32 = arith.constant 0 : i32
    %c0_i32_0 = arith.constant 0 : i32
    %c0_i32_1 = arith.constant 0 : i32
    return %arg0, %c0_i32, %c0_i32_0 : i32, i32, i32
  }
}

</mosaic_0001>

<bundles_post_ra>
// kernel: tpu_custom_call.1
= control target key start
LH: loop header
LB: loop body
LE: loop exit
PB: predicated region body
PF: predicated region fallthrough
CT: control target
= control target key end

     0   :  { %9 = vsyncpa [#allocation3], 0  ;;  %s1577_s0 = inlined_call_operand.hbm [shape: f32[4,8,32], index: 0, kind: input, shape index: {}]   ;;  %s1578_s1 = inlined_call_operand.hbm [shape: f32[4,8,32], index: 1, kind: input, shape index: {}]   ;;  %s1579_s2 = inlined_call_operand.hbm [shape: f32[4,8,33], index: 2, kind: input, shape index: {}]   ;;  %s1580_s3 = inlined_call_operand.hbm [shape: f32[32,128], index: 3, kind: input, shape index: {}]   ;;  %s1581_s4 = inlined_call_operand.hbm [shape: f32[1,8,128], index: 4, kind: output, shape index: {}]  }
   0x1   :  { %10 = vsyncpa [#allocation6], 0 }
   0x2   :  { %11 = vsyncpa [#allocation9], 0 }
   0x3   :  { %12 = vsyncpa [#allocation4], 0  ;;  %s30_s17 = sshll.u32 %s1578_s1, 4  ;;  %s1290_s18 = smov [#allocation5]   ;;  %s31_s17 = int_to_ptr.hbm [resolvable:$true] %s30_s17 }
   0x4   :  { %s32_s19 = sshll.u32 %s1290_s18, 4  ;;  %s17_s22 = sshll.u32 %s1577_s0, 4  ;;  %s33_s19 = int_to_ptr.vmem [resolvable:$true] %s32_s19  ;;  %s18_s22 = int_to_ptr.hbm [resolvable:$true] %s17_s22 }
   0x5   :  { %s1291_s23 = smov 128   ;;  %s1292_s24 = smov 8  }
   0x6   :  { %38 = dma.hbm_to_vmem [thread:$0]  %s31_s17, 512, %s33_s19, [#allocation6], %s1291_s23, %s1291_s23, %s1292_s24  }
   0x7   :  { %s1293_s25 = smov [#allocation2]   ;;  %s43_s29 = sshll.u32 %s1579_s2, 4  ;;  %s44_s29 = int_to_ptr.hbm [resolvable:$true] %s43_s29 }
   0x8   :  { %s19_s26 = sshll.u32 %s1293_s25, 4  ;;  %s56_s5 = sshll.u32 %s1580_s3, 4  ;;  %s20_s26 = int_to_ptr.vmem [resolvable:$true] %s19_s26  ;;  %s57_s5 = int_to_ptr.hbm [resolvable:$true] %s56_s5 }
   0x9   :  { %25 = dma.hbm_to_vmem [thread:$0]  %s18_s22, 512, %s20_s26, [#allocation3], %s1291_s23, %s1291_s23, %s1292_s24  }
   0xa   :  { %s1294_s6 = smov [#allocation7]   ;;  %s1295_s0 = smov [#allocation8]  }
   0xb   :  { %s45_s7 = sshll.u32 %s1294_s6, 4  ;;  %s58_s8 = sshll.u32 %s1295_s0, 4  ;;  %s46_s7 = int_to_ptr.vmem [resolvable:$true] %s45_s7  ;;  %s59_s8 = int_to_ptr.vmem [resolvable:$true] %s58_s8 }
   0xc   :  { %51 = dma.hbm_to_vmem [thread:$0]  %s44_s29, 512, %s46_s7, [#allocation6], %s1291_s23, %s1291_s23, %s1292_s24  }
   0xd   :  { %64 = dma.hbm_to_vmem [thread:$0]  %s57_s5, 512, %s59_s8, [#allocation9], %s1291_s23, %s1291_s23, %s1292_s24  }
   0xe   :  { %1282 = dma.done.wait [#allocation3], 512  }
   0xf   :  { %1283 = vsyncadd [#allocation3], 4294966784 }
  0x10   :  { %1284 = dma.done.wait [#allocation6], 1024  }
  0x11   :  { %1285 = vsyncadd [#allocation6], 4294966272 }
  0x12   :  { %1286 = dma.done.wait [#allocation9], 512  }
  0x13   :  { %1287 = vsyncadd [#allocation9], 4294966784  ;;  %v84_v0 = vld [vmem:[#allocation8 + $0x18] sm:$0xff]  ;;  %v83_v1 = vld [vmem:[#allocation8 + $0x10] sm:$0xff]  ;;  %vm93_vm0 = vcmask 261120   ;;  %v256_v15 = vlaneseq  ;;  %v1296_v24 = vmov 0.0  }
  0x14   :  { %159 = vmatpush.msra.mxu1 %v84_v0  ;;  %v89_v2 = vld [vmem:[#allocation5] sm:$0xff]  ;;  %118 = vmatpush.msra.mxu0 %v84_v0  ;;  %v82_v3 = vld [vmem:[#allocation8 + $0x8] sm:$0xff]  ;;  %v91_v5 = vld [vmem:[#allocation5 + $0x10] sm:$0xff]  ;;  %vm298_vm2 = vcmask 64512   ;;  %s1298_s2 = smov 32   ;;  %s1299_s3 = smov 64  }
  0x15   :  { %v196_v4 = vmul.f32 %v89_v2, %v89_v2  ;;  %v198_v6 = vmul.f32 %v91_v5, %v91_v5  ;;  %v81_v7 = vld [vmem:[#allocation8] sm:$0xff]  ;;  %v1342_v10 = vld [vmem:[#allocation5 + $0x8] sm:$0xff]  ;;  %v257_v18 = vand.u32 127, %v256_v15  ;;  %v92_v46 = vld [vmem:[#allocation5 + $0x18] sm:$0xff]  ;;  %s1300_s9 = smov 96   ;;  %s1301_s10 = smov [#allocation10]  }
  0x16   :  { %160 = vmatpush.msra.mxu1 %v83_v1  ;;  %119 = vmatpush.msra.mxu0 %v83_v1  ;;  %v265_v16 = vld [vmem:[#allocation7] sm:$0xff]  ;;  %v199_v51 = vmul.f32 %v92_v46, %v92_v46  ;;  %v197_v55 = vmul.f32 %v1342_v10, %v1342_v10  ;;  %s1037_s11 = sshll.u32 %s1301_s10, 4  ;;  %s1039_s14 = sshll.u32 %s1581_s4, 4  ;;  %s1038_s11 = int_to_ptr.vmem [resolvable:$true] %s1037_s11  ;;  %s1040_s14 = int_to_ptr.hbm [resolvable:$true] %s1039_s14 }
  0x17   :  { %v200_v8 = vsel %vm93_vm0, %v196_v4, 0.0  ;;  %v206_v9 = vsel %vm93_vm0, %v198_v6, 0.0  ;;  %362 = vmatpush.msra.mxu2 %v265_v16  ;;  %vm258_vm1 = vcmp.lt.s32.totalorder %v257_v18, 110  ;;  %v85_v45 = vld [vmem:[#allocation2] sm:$0xff]  ;;  %v87_v4 = vld [vmem:[#allocation2 + $0x10] sm:$0xff] }
  0x18   :  { %161 = vmatpush.msra.mxu1 %v82_v3  ;;  %201 = vadd.xlane.f32.xlu0 %v200_v8  ;;  %v1349_v25 = vsel %vm258_vm1, 1.0, %v1296_v24  ;;  %v176_v47 = vmul.f32 %v85_v45, %v85_v45  ;;  %v209_v52 = vsel %vm93_vm0, %v199_v51, 0.0  ;;  %v203_v58 = vsel %vm93_vm0, %v197_v55, 0.0 }
  0x19   :  { %207 = vadd.xlane.f32.xlu1 %v206_v9  ;;  %120 = vmatpush.msra.mxu0 %v82_v3 }
  0x1a   :  { %162 = vmatpush.msra.mxu1 %v81_v7  ;;  %v180_v49 = vsel %vm93_vm0, %v176_v47, 0.0 }
  0x1b   :  { %1055 = vmatmul.msk.f32.vlgmr.msra.gmra.mxu1 %vm93_vm0, %v89_v2  ;;  %121 = vmatpush.msra.mxu0 %v81_v7 }
  0x1c   :  { %1051 = vmatmul.msk.f32.vlgmr.msra.gmra.mxu0 %vm93_vm0, %v85_v45 }
  0x21   :  { %181 = vadd.xlane.f32.xlu1 %v180_v49 }
  0x23   :  { %1056 = vmatmul.msk.f32.gmra.mxu1 %vm93_vm0, %v1342_v10 }
  0x29   :  { %210 = vadd.xlane.f32.xlu1 %v209_v52 }
  0x2b   :  { %1057 = vmatmul.msk.f32.gmra.mxu1 %vm93_vm0, %v91_v5  ;;  %v178_v5 = vmul.f32 %v87_v4, %v87_v4 }
  0x2d   :  { %v186_v6 = vsel %vm93_vm0, %v178_v5, 0.0 }
  0x31   :  { %187 = vadd.xlane.f32.xlu1 %v186_v6 }
  0x33   :  { %1058 = vmatmul.msk.f32.gmra.mxu1 %vm93_vm0, %v92_v46 }
  0x8b   :  { %v202_v11 = vpop.xlane.xlu0 %201 }
  0x8c   :  { %v212_v12 = vmul.f32 0.5, %v202_v11  ;;  %v208_v20 = vpop.xlane.xlu1 %207 }
  0x8d   :  { %v214_v23 = vmul.f32 0.5, %v208_v20 }
  0x94   :  { %v182_v18 = vpop.xlane.xlu1 %181 }
  0x98   :  { %v164_v13 = vpop.f32.mrf.mxu1 }
  0x99   :  { %v236_v14 = vsub.f32 %v164_v13, %v212_v12  ;;  %v123_v55 = vpop.f32.mrf.mxu0 }
  0x9b   :  { %v240_v17 = vmul.f32 1.442695, %v236_v14 }
  0x9d   :  { %1138 = vpow2.f32 %v240_v17 }
  0xa0   :  { %v1347_v19 = vpop.f32.mrf.mxu1 }
  0xa3   :  { %v1139_v21 = vpop.eup %1138 }
  0xa4   :  { %v248_v22 = vadd.f32 0.0001, %v1139_v21 }
  0xa6   :  { %v252_v26 = vmul.f32 0.09534626, %v248_v22  ;;  %v211_v22 = vpop.xlane.xlu1 %210 }
  0xa8   :  { %v170_v27 = vpop.f32.mrf.mxu1  ;;  %v261_v28 = vmul.f32 %v1349_v25, %v252_v26 }
  0xa9   :  { %v238_v29 = vsub.f32 %v170_v27, %v214_v23  ;;  %v215_v23 = vmul.f32 0.5, %v211_v22 }
  0xaa   :  { %266 = vxpose.xlu0.b32.start.end [1/1] (short) %v261_v28, 128 }
  0xab   :  { %v244_v30 = vmul.f32 1.442695, %v238_v29 }
  0xad   :  { %1140 = vpow2.f32 %v244_v30 }
  0xb0   :  { %v173_v26 = vpop.f32.mrf.mxu1 }
  0xb1   :  { %v239_v27 = vsub.f32 %v173_v26, %v215_v23 }
  0xb3   :  { %v1141_v31 = vpop.eup %1140  ;;  %v246_v29 = vmul.f32 1.442695, %v239_v27 }
  0xb4   :  { %v250_v32 = vadd.f32 0.0001, %v1141_v31  ;;  %v1415_v31 = vld [vmem:[#allocation2 + $0x8] sm:$0xff] }
  0xb5   :  { %1142 = vpow2.f32 %v246_v29  ;;  %1052 = vmatmul.msk.f32.gmra.mxu0 %vm93_vm0, %v1415_v31 }
  0xb6   :  { %v254_v33 = vmul.f32 0.09534626, %v250_v32 }
  0xb8   :  { %v263_v34 = vmul.f32 %v1349_v25, %v254_v33 }
  0xba   :  { %648 = vxpose.xlu2.b32.start.end [1/1] (short) %v263_v34, 128 }
  0xbb   :  { %v1143_v32 = vpop.eup %1142 }
  0xbc   :  { %v251_v34 = vadd.f32 0.0001, %v1143_v32 }
  0xbd   :  { %1053 = vmatmul.msk.f32.gmra.mxu0 %vm93_vm0, %v87_v4 }
 0x14e   :  { %v282_v35 = vpop.trf.xlu0 }
 0x14f   :  { %1060 = vmatmul.msk.f32.vlgmr.msra.gmra.mxu2 %vm298_vm2, %v282_v35 }
 0x153   :  { %v1358_v41 = vpop.trf.xlu2 }
 0x156   :  { %v283_v36 = vpop.trf.xlu0 }
 0x157   :  { %1061 = vmatmul.msk.f32.gmra.mxu2 %vm298_vm2, %v283_v36 }
 0x15b   :  { %v1362_v43 = vpop.trf.xlu2 }
 0x15e   :  { %v284_v37 = vpop.trf.xlu0 }
 0x15f   :  { %1062 = vmatmul.msk.f32.gmra.mxu2 %vm298_vm2, %v284_v37 }
 0x163   :  { %v1367_v48 = vpop.trf.xlu2 }
 0x166   :  { %v285_v38 = vpop.trf.xlu0 }
 0x167   :  { %1063 = vmatmul.msk.f32.gmra.mxu2 %vm298_vm2, %v285_v38  ;;  %v255_v38 = vmul.f32 0.09534626, %v251_v34 }
 0x16b   :  { %v1372_v53 = vpop.trf.xlu2 }
 0x16e   :  { %v286_v39 = vpop.trf.xlu0 }
 0x16f   :  { %1064 = vmatmul.msk.f32.gmra.mxu2 %vm298_vm2, %v286_v39 }
 0x173   :  { %v1377_v57 = vpop.trf.xlu2 }
 0x176   :  { %v287_v40 = vpop.trf.xlu0 }
 0x177   :  { %1065 = vmatmul.msk.f32.gmra.mxu2 %vm298_vm2, %v287_v40  ;;  %v264_v40 = vmul.f32 %v1349_v25, %v255_v38 }
 0x179   :  { %841 = vxpose.xlu0.b32.start.end [1/1] (short) %v264_v40, 128 }
 0x17b   :  { %v1382_v60 = vpop.trf.xlu2 }
 0x17e   :  { %v288_v42 = vpop.trf.xlu0 }
 0x17f   :  { %1066 = vmatmul.msk.f32.gmra.mxu2 %vm298_vm2, %v288_v42 }
 0x183   :  { %v1385_v62 = vpop.trf.xlu2 }
 0x186   :  { %v289_v44 = vpop.trf.xlu0 }
 0x187   :  { %1067 = vmatmul.msk.f32.gmra.mxu2 %vm298_vm2, %v289_v44 }
 0x18b   :  { %v1388_v0 = vpop.trf.xlu2 }
 0x18e   :  { %v290_v50 = vpop.trf.xlu0 }
 0x18f   :  { %1068 = vmatmul.msk.f32.gmra.mxu2 %vm298_vm2, %v290_v50 }
 0x193   :  { %v1391_v3 = vpop.trf.xlu2 }
 0x196   :  { %v291_v54 = vpop.trf.xlu0 }
 0x197   :  { %1069 = vmatmul.msk.f32.gmra.mxu2 %vm298_vm2, %v291_v54  ;;  %v192_v54 = vmul.f32 0.5, %v182_v18 }
 0x19b   :  { %v1395_v7 = vpop.trf.xlu2 }
 0x19e   :  { %v292_v56 = vpop.trf.xlu0 }
 0x19f   :  { %1070 = vmatmul.msk.f32.gmra.mxu2 %vm298_vm2, %v292_v56  ;;  %v216_v56 = vsub.f32 %v123_v55, %v192_v54 }
 0x1a3   :  { %204 = vadd.xlane.f32.xlu2 %v203_v58  ;;  %v1401_v10 = vpop.trf.xlu2  ;;  %v220_v58 = vmul.f32 1.442695, %v216_v56 }
 0x1a6   :  { %v293_v59 = vpop.trf.xlu0 }
 0x1a7   :  { %1071 = vmatmul.msk.f32.gmra.mxu2 %vm298_vm2, %v293_v59 }
 0x1ab   :  { %v1405_v12 = vpop.trf.xlu2 }
 0x1ae   :  { %v294_v61 = vpop.trf.xlu0 }
 0x1af   :  { %1072 = vmatmul.msk.f32.gmra.mxu2 %vm298_vm2, %v294_v61 }
 0x1b3   :  { %v1407_v14 = vpop.trf.xlu2 }
 0x1b6   :  { %v295_v63 = vpop.trf.xlu0 }
 0x1b7   :  { %1073 = vmatmul.msk.f32.gmra.mxu2 %vm298_vm2, %v295_v63  ;;  %v647_v63 = vld [vmem:[#allocation7 + $0x10] sm:$0xff] }
 0x1bb   :  { %v1409_v16 = vpop.trf.xlu2 }
 0x1be   :  { %v296_v1 = vpop.trf.xlu0 }
 0x1bf   :  { %1074 = vmatmul.msk.f32.gmra.mxu2 %vm298_vm2, %v296_v1  ;;  %v1436_v1 = vpop.f32.mrf.mxu0 }
 0x1c3   :  { %v1411_v21 = vpop.trf.xlu2 }
 0x1c6   :  { %v297_v2 = vpop.trf.xlu0 }
 0x1c7   :  { %1075 = vmatmul.msk.f32.gmra.mxu2 %vm298_vm2, %v297_v2  ;;  %v188_v2 = vpop.xlane.xlu1 %187 }
 0x1c8   :  { %v1438_v4 = vmul.f32 0.5, %v188_v2 }
 0x1cb   :  { %v1413_v28 = vpop.trf.xlu2 }
 0x1d2   :  { %v1397_v8 = vpop.f32.mrf.mxu2 }
 0x1da   :  { %v1399_v9 = vpop.f32.mrf.mxu2 }
 0x1e2   :  { %v1403_v11 = vpop.f32.mrf.mxu2 }
 0x1ea   :  { %v373_v13 = vpop.f32.mrf.mxu2 }
 0x1f2   :  { %v376_v15 = vpop.f32.mrf.mxu2 }
 0x1fa   :  { %v379_v17 = vpop.f32.mrf.mxu2 }
 0x202   :  { %v382_v20 = vpop.f32.mrf.mxu2 }
 0x20a   :  { %v385_v24 = vpop.f32.mrf.mxu2 }
 0x212   :  { %v388_v30 = vpop.f32.mrf.mxu2 }
 0x216   :  { %v205_v33 = vpop.xlane.xlu2 %204 }
 0x217   :  { %v213_v35 = vmul.f32 0.5, %v205_v33 }
 0x219   :  { %v237_v36 = vsub.f32 %v1347_v19, %v213_v35 }
 0x21a   :  { %v391_v37 = vpop.f32.mrf.mxu2 }
 0x21b   :  { %v242_v39 = vmul.f32 1.442695, %v237_v36 }
 0x21d   :  { %1144 = vpow2.f32 %v242_v39 }
 0x21e   :  { %1146 = vpow2.f32 %v220_v58 }
 0x222   :  { %v394_v42 = vpop.f32.mrf.mxu2 }
 0x223   :  { %v1145_v44 = vpop.eup %1144 }
 0x224   :  { %v249_v45 = vadd.f32 0.0001, %v1145_v44 }
 0x226   :  { %v253_v46 = vmul.f32 0.09534626, %v249_v45 }
 0x228   :  { %v262_v47 = vmul.f32 %v1349_v25, %v253_v46  ;;  %v1147_v25 = vpop.eup %1146 }
 0x229   :  { %v228_v59 = vadd.f32 0.0001, %v1147_v25  ;;  %v840_v25 = vld [vmem:[#allocation7 + $0x18] sm:$0xff] }
 0x22a   :  { %v397_v49 = vpop.f32.mrf.mxu2  ;;  %455 = vxpose.xlu1.b32.start.end [1/1] (short) %v262_v47, 128 }
 0x22b   :  { %v232_v61 = vmul.f32 0.09534626, %v228_v59 }
 0x232   :  { %v400_v50 = vpop.f32.mrf.mxu2 }
 0x23a   :  { %v403_v51 = vpop.f32.mrf.mxu2 }
 0x242   :  { %v406_v19 = vpop.f32.mrf.mxu2 }
 0x24a   :  { %v409_v52 = vpop.f32.mrf.mxu2 }
 0x24b   :  { %412 = vmatpush.msra.mxu3 %v409_v52 }
 0x24d   :  { %413 = vmatpush.msra.mxu3 %v406_v19 }
 0x24f   :  { %414 = vmatpush.msra.mxu3 %v403_v51 }
 0x251   :  { %415 = vmatpush.msra.mxu3 %v400_v50 }
 0x253   :  { %416 = vmatpush.msra.mxu3 %v397_v49  ;;  %v857_v49 = vpop.trf.xlu0 }
 0x255   :  { %417 = vmatpush.msra.mxu3 %v394_v42 }
 0x257   :  { %418 = vmatpush.msra.mxu3 %v391_v37 }
 0x259   :  { %419 = vmatpush.msra.mxu3 %v388_v30 }
 0x25b   :  { %420 = vmatpush.msra.mxu3 %v385_v24  ;;  %v858_v19 = vpop.trf.xlu0 }
 0x25d   :  { %421 = vmatpush.msra.mxu3 %v382_v20 }
 0x25f   :  { %422 = vmatpush.msra.mxu3 %v379_v17 }
 0x261   :  { %423 = vmatpush.msra.mxu3 %v376_v15 }
 0x263   :  { %424 = vmatpush.msra.mxu3 %v373_v13  ;;  %v859_v56 = vpop.trf.xlu0 }
 0x265   :  { %425 = vmatpush.msra.mxu3 %v1403_v11 }
 0x267   :  { %426 = vmatpush.msra.mxu3 %v1399_v9 }
 0x269   :  { %427 = vmatpush.msra.mxu3 %v1397_v8  ;;  %v177_v8 = vmul.f32 %v1415_v31, %v1415_v31 }
 0x26a   :  { %428 = vmatmul.f32.vlgmr.msra.gmra.mxu3 %v232_v61 }
 0x26b   :  { %743 = vmatpush.msrb.mxu3 %v647_v63  ;;  %v183_v11 = vsel %vm93_vm0, %v177_v8, 0.0  ;;  %v860_v61 = vpop.trf.xlu0 }
 0x272   :  { %1092 = vmatmul.msk.f32.vlgmr.msrb.gmra.mxu3 %vm298_vm2, %v1358_v41  ;;  %v1442_v41 = vpop.f32.mrf.mxu0 }
 0x27a   :  { %1093 = vmatmul.msk.f32.gmra.mxu3 %vm298_vm2, %v1362_v43  ;;  %v218_v43 = vsub.f32 %v1442_v41, %v1438_v4  ;;  %v861_v4 = vpop.trf.xlu0 }
 0x27c   :  { %v224_v50 = vmul.f32 1.442695, %v218_v43 }
 0x27e   :  { %1148 = vpow2.f32 %v224_v50 }
 0x282   :  { %1094 = vmatmul.msk.f32.gmra.mxu3 %vm298_vm2, %v1367_v48  ;;  %v88_v48 = vld [vmem:[#allocation2 + $0x18] sm:$0xff]  ;;  %v862_v43 = vpop.trf.xlu0 }
 0x283   :  { %1054 = vmatmul.msk.f32.gmra.mxu0 %vm93_vm0, %v88_v48 }
 0x284   :  { %v1149_v52 = vpop.eup %1148 }
 0x285   :  { %v230_v55 = vadd.f32 0.0001, %v1149_v52 }
 0x287   :  { %v234_v58 = vmul.f32 0.09534626, %v230_v55 }
 0x28a   :  { %1095 = vmatmul.msk.f32.gmra.mxu3 %vm298_vm2, %v1372_v53  ;;  %v454_v53 = vld [vmem:[#allocation7 + $0x8] sm:$0xff] }
 0x28b   :  { %550 = vmatpush.msrb.mxu0 %v454_v53  ;;  %v863_v53 = vpop.trf.xlu0 }
 0x292   :  { %1096 = vmatmul.msk.f32.gmra.mxu3 %vm298_vm2, %v1377_v57 }
 0x29a   :  { %1097 = vmatmul.msk.f32.gmra.mxu3 %vm298_vm2, %v1382_v60 }
 0x2a2   :  { %1098 = vmatmul.msk.f32.gmra.mxu3 %vm298_vm2, %v1385_v62 }
 0x2aa   :  { %1099 = vmatmul.msk.f32.gmra.mxu3 %vm298_vm2, %v1388_v0 }
 0x2b2   :  { %1100 = vmatmul.msk.f32.gmra.mxu3 %vm298_vm2, %v1391_v3 }
 0x2ba   :  { %1101 = vmatmul.msk.f32.gmra.mxu3 %vm298_vm2, %v1395_v7 }
 0x2c2   :  { %1102 = vmatmul.msk.f32.gmra.mxu3 %vm298_vm2, %v1401_v10 }
 0x2ca   :  { %1103 = vmatmul.msk.f32.gmra.mxu3 %vm298_vm2, %v1405_v12  ;;  %v179_v12 = vmul.f32 %v88_v48, %v88_v48 }
 0x2cc   :  { %v189_v13 = vsel %vm93_vm0, %v179_v12, 0.0 }
 0x2cd   :  { %190 = vadd.xlane.f32.xlu0 %v189_v13 }
 0x2ce   :  { %v471_v57 = vpop.trf.xlu1 }
 0x2cf   :  { %1076 = vmatmul.msk.f32.vlgmr.msrb.gmra.mxu0 %vm298_vm2, %v471_v57 }
 0x2d2   :  { %1104 = vmatmul.msk.f32.gmra.mxu3 %vm298_vm2, %v1407_v14 }
 0x2d6   :  { %v472_v60 = vpop.trf.xlu1 }
 0x2d7   :  { %1077 = vmatmul.msk.f32.gmra.mxu0 %vm298_vm2, %v472_v60  ;;  %v864_v60 = vpop.trf.xlu0 }
 0x2da   :  { %1105 = vmatmul.msk.f32.gmra.mxu3 %vm298_vm2, %v1409_v16 }
 0x2de   :  { %v473_v62 = vpop.trf.xlu1 }
 0x2df   :  { %1078 = vmatmul.msk.f32.gmra.mxu0 %vm298_vm2, %v473_v62 }
 0x2e2   :  { %1106 = vmatmul.msk.f32.gmra.mxu3 %vm298_vm2, %v1411_v21 }
 0x2e6   :  { %v474_v0 = vpop.trf.xlu1 }
 0x2e7   :  { %1079 = vmatmul.msk.f32.gmra.mxu0 %vm298_vm2, %v474_v0 }
 0x2ea   :  { %1107 = vmatmul.msk.f32.gmra.mxu3 %vm298_vm2, %v1413_v28 }
 0x2ed   :  { %v1471_v3 = vpop.f32.mrf.mxu3 }
 0x2ee   :  { %v475_v5 = vpop.trf.xlu1  ;;  %vm437_vm1 = vweird.f32 %v1471_v3 }
 0x2ef   :  { %1080 = vmatmul.msk.f32.gmra.mxu0 %vm298_vm2, %v475_v5  ;;  %v865_v5 = vpop.trf.xlu0 }
 0x2f5   :  { %v1474_v6 = vpop.f32.mrf.mxu3 }
 0x2f6   :  { %v476_v7 = vpop.trf.xlu1 }
 0x2f7   :  { %1081 = vmatmul.msk.f32.gmra.mxu0 %vm298_vm2, %v476_v7 }
 0x2fd   :  { %v1479_v9 = vpop.f32.mrf.mxu3 }
 0x2fe   :  { %v477_v10 = vpop.trf.xlu1 }
 0x2ff   :  { %1082 = vmatmul.msk.f32.gmra.mxu0 %vm298_vm2, %v477_v10 }
 0x300   :  { %v1492_v32 = vpop.f32.mrf.mxu0 }
 0x302   :  { %184 = vadd.xlane.f32.xlu1 %v183_v11 }
 0x305   :  { %v751_v14 = vpop.f32.mrf.mxu3 }
 0x306   :  { %v478_v15 = vpop.trf.xlu1 }
 0x307   :  { %1083 = vmatmul.msk.f32.gmra.mxu0 %vm298_vm2, %v478_v15 }
 0x30d   :  { %v754_v16 = vpop.f32.mrf.mxu3 }
 0x30e   :  { %v479_v17 = vpop.trf.xlu1 }
 0x30f   :  { %1084 = vmatmul.msk.f32.gmra.mxu0 %vm298_vm2, %v479_v17 }
 0x315   :  { %v757_v18 = vpop.f32.mrf.mxu3 }
 0x316   :  { %v480_v20 = vpop.trf.xlu1 }
 0x317   :  { %1085 = vmatmul.msk.f32.gmra.mxu0 %vm298_vm2, %v480_v20 }
 0x31d   :  { %v760_v21 = vpop.f32.mrf.mxu3 }
 0x31e   :  { %v481_v22 = vpop.trf.xlu1 }
 0x31f   :  { %1086 = vmatmul.msk.f32.gmra.mxu0 %vm298_vm2, %v481_v22 }
 0x325   :  { %v763_v23 = vpop.f32.mrf.mxu3 }
 0x326   :  { %v482_v24 = vpop.trf.xlu1 }
 0x327   :  { %1087 = vmatmul.msk.f32.gmra.mxu0 %vm298_vm2, %v482_v24 }
 0x32d   :  { %v766_v26 = vpop.f32.mrf.mxu3 }
 0x32e   :  { %v483_v27 = vpop.trf.xlu1 }
 0x32f   :  { %1088 = vmatmul.msk.f32.gmra.mxu0 %vm298_vm2, %v483_v27 }
 0x335   :  { %v769_v28 = vpop.f32.mrf.mxu3 }
 0x336   :  { %v484_v29 = vpop.trf.xlu1 }
 0x337   :  { %1089 = vmatmul.msk.f32.gmra.mxu0 %vm298_vm2, %v484_v29 }
 0x33d   :  { %v772_v30 = vpop.f32.mrf.mxu3 }
 0x33e   :  { %v485_v31 = vpop.trf.xlu1 }
 0x33f   :  { %1090 = vmatmul.msk.f32.gmra.mxu0 %vm298_vm2, %v485_v31  ;;  %v1297_v31 = vmov 32  }
 0x340   :  { %1136 = vset.pattern.permute.xlu2 %v1297_v31  ;;  %1137 = vset.pattern.permute.xlu0 %v1297_v31 }
 0x345   :  { %v775_v33 = vpop.f32.mrf.mxu3 }
 0x346   :  { %v486_v34 = vpop.trf.xlu1 }
 0x347   :  { %1091 = vmatmul.msk.f32.gmra.mxu0 %vm298_vm2, %v486_v34 }
 0x34c   :  { %v1495_v35 = vpop.f32.mrf.mxu0 }
 0x34d   :  { %v778_v36 = vpop.f32.mrf.mxu3 }
 0x354   :  { %v1497_v37 = vpop.f32.mrf.mxu0 }
 0x355   :  { %v781_v38 = vpop.f32.mrf.mxu3 }
 0x35c   :  { %v1499_v39 = vpop.f32.mrf.mxu0 }
 0x35d   :  { %v784_v40 = vpop.f32.mrf.mxu3 }
 0x364   :  { %v1501_v42 = vpop.f32.mrf.mxu0 }
 0x365   :  { %v787_v44 = vpop.f32.mrf.mxu3 }
 0x36c   :  { %v1503_v45 = vpop.f32.mrf.mxu0 }
 0x36d   :  { %v790_v46 = vpop.f32.mrf.mxu3 }
 0x36e   :  { %793 = vmatpush.msrb.mxu1 %v790_v46 }
 0x370   :  { %794 = vmatpush.msrb.mxu1 %v787_v44 }
 0x372   :  { %795 = vmatpush.msrb.mxu1 %v784_v40 }
 0x374   :  { %v1505_v47 = vpop.f32.mrf.mxu0  ;;  %796 = vmatpush.msrb.mxu1 %v781_v38 }
 0x376   :  { %797 = vmatpush.msrb.mxu1 %v778_v36 }
 0x378   :  { %798 = vmatpush.msrb.mxu1 %v775_v33 }
 0x37a   :  { %799 = vmatpush.msrb.mxu1 %v772_v30 }
 0x37c   :  { %v570_v51 = vpop.f32.mrf.mxu0  ;;  %800 = vmatpush.msrb.mxu1 %v769_v28 }
 0x37e   :  { %801 = vmatpush.msrb.mxu1 %v766_v26 }
 0x380   :  { %802 = vmatpush.msrb.mxu1 %v763_v23 }
 0x382   :  { %803 = vmatpush.msrb.mxu1 %v760_v21 }
 0x384   :  { %v573_v54 = vpop.f32.mrf.mxu0  ;;  %804 = vmatpush.msrb.mxu1 %v757_v18 }
 0x386   :  { %805 = vmatpush.msrb.mxu1 %v754_v16 }
 0x388   :  { %806 = vmatpush.msrb.mxu1 %v751_v14 }
 0x38a   :  { %807 = vmatpush.msrb.mxu1 %v1479_v9  ;;  %v866_v9 = vpop.trf.xlu0 }
 0x38c   :  { %v576_v59 = vpop.f32.mrf.mxu0  ;;  %808 = vmatpush.msrb.mxu1 %v1474_v6  ;;  %v185_v6 = vpop.xlane.xlu1 %184 }
 0x38d   :  { %809 = vmatmul.f32.vlgmr.msrb.gmra.mxu1 %v234_v58  ;;  %v193_v7 = vmul.f32 0.5, %v185_v6 }
 0x38e   :  { %936 = vmatpush.msra.mxu1 %v840_v25 }
 0x38f   :  { %v217_v8 = vsub.f32 %v1436_v1, %v193_v7 }
 0x391   :  { %v222_v10 = vmul.f32 1.442695, %v217_v8 }
 0x392   :  { %v867_v11 = vpop.trf.xlu0 }
 0x393   :  { %1150 = vpow2.f32 %v222_v10 }
 0x394   :  { %v579_v63 = vpop.f32.mrf.mxu0 }
 0x395   :  { %1108 = vmatmul.msk.f32.vlgmr.msra.gmra.mxu1 %vm298_vm2, %v857_v49 }
 0x399   :  { %v1151_v12 = vpop.eup %1150 }
 0x39a   :  { %v229_v1 = vadd.f32 0.0001, %v1151_v12  ;;  %v868_v14 = vpop.trf.xlu0 }
 0x39c   :  { %v582_v2 = vpop.f32.mrf.mxu0  ;;  %v233_v13 = vmul.f32 0.09534626, %v229_v1 }
 0x39d   :  { %1109 = vmatmul.msk.f32.gmra.mxu1 %vm298_vm2, %v858_v19 }
 0x3a2   :  { %v869_v15 = vpop.trf.xlu0 }
 0x3a4   :  { %v585_v41 = vpop.f32.mrf.mxu0 }
 0x3a5   :  { %1110 = vmatmul.msk.f32.gmra.mxu1 %vm298_vm2, %v859_v56 }
 0x3aa   :  { %v870_v16 = vpop.trf.xlu0 }
 0x3ac   :  { %v588_v48 = vpop.f32.mrf.mxu0 }
 0x3ad   :  { %1111 = vmatmul.msk.f32.gmra.mxu1 %vm298_vm2, %v860_v61 }
 0x3b2   :  { %v871_v17 = vpop.trf.xlu0 }
 0x3b4   :  { %v591_v57 = vpop.f32.mrf.mxu0 }
 0x3b5   :  { %1112 = vmatmul.msk.f32.gmra.mxu1 %vm298_vm2, %v861_v4 }
 0x3ba   :  { %v872_v20 = vpop.trf.xlu0 }
 0x3bc   :  { %v594_v62 = vpop.f32.mrf.mxu0 }
 0x3bd   :  { %1113 = vmatmul.msk.f32.gmra.mxu1 %vm298_vm2, %v862_v43 }
 0x3c4   :  { %v597_v0 = vpop.f32.mrf.mxu0 }
 0x3c5   :  { %600 = vmatpush.msrb.mxu2 %v597_v0  ;;  %1114 = vmatmul.msk.f32.gmra.mxu1 %vm298_vm2, %v863_v53 }
 0x3c7   :  { %601 = vmatpush.msrb.mxu2 %v594_v62 }
 0x3c9   :  { %602 = vmatpush.msrb.mxu2 %v591_v57 }
 0x3cb   :  { %603 = vmatpush.msrb.mxu2 %v588_v48 }
 0x3cd   :  { %604 = vmatpush.msrb.mxu2 %v585_v41  ;;  %1115 = vmatmul.msk.f32.gmra.mxu1 %vm298_vm2, %v864_v60  ;;  %v191_v41 = vpop.xlane.xlu0 %190 }
 0x3ce   :  { %v195_v43 = vmul.f32 0.5, %v191_v41 }
 0x3cf   :  { %605 = vmatpush.msrb.mxu2 %v582_v2 }
 0x3d0   :  { %v219_v48 = vsub.f32 %v1492_v32, %v195_v43 }
 0x3d1   :  { %606 = vmatpush.msrb.mxu2 %v579_v63 }
 0x3d2   :  { %v226_v53 = vmul.f32 1.442695, %v219_v48 }
 0x3d3   :  { %607 = vmatpush.msrb.mxu2 %v576_v59 }
 0x3d5   :  { %608 = vmatpush.msrb.mxu2 %v573_v54  ;;  %1116 = vmatmul.msk.f32.gmra.mxu1 %vm298_vm2, %v865_v5 }
 0x3d7   :  { %609 = vmatpush.msrb.mxu2 %v570_v51 }
 0x3d9   :  { %610 = vmatpush.msrb.mxu2 %v1505_v47 }
 0x3db   :  { %611 = vmatpush.msrb.mxu2 %v1503_v45 }
 0x3dd   :  { %612 = vmatpush.msrb.mxu2 %v1501_v42  ;;  %1117 = vmatmul.msk.f32.gmra.mxu1 %vm298_vm2, %v866_v9 }
 0x3df   :  { %613 = vmatpush.msrb.mxu2 %v1499_v39 }
 0x3e1   :  { %614 = vmatpush.msrb.mxu2 %v1497_v37 }
 0x3e3   :  { %615 = vmatpush.msrb.mxu2 %v1495_v35 }
 0x3e4   :  { %616 = vmatmul.f32.vlgmr.msrb.gmra.mxu2 %v233_v13 }
 0x3e5   :  { %1118 = vmatmul.msk.f32.gmra.mxu1 %vm298_vm2, %v867_v11 }
 0x3ed   :  { %1119 = vmatmul.msk.f32.gmra.mxu1 %vm298_vm2, %v868_v14 }
 0x3f5   :  { %1120 = vmatmul.msk.f32.gmra.mxu1 %vm298_vm2, %v869_v15 }
 0x3fd   :  { %1121 = vmatmul.msk.f32.gmra.mxu1 %vm298_vm2, %v870_v16 }
 0x405   :  { %1122 = vmatmul.msk.f32.gmra.mxu1 %vm298_vm2, %v871_v17 }
 0x40a   :  { %v1534_v18 = vpop.f32.mrf.mxu1 }
 0x40b   :  { %1152 = vrcp.f32 %v1534_v18  ;;  %v824_v58 = vand.u32 2147483648, %v1534_v18  ;;  %vm818_vm8 = vweird.f32 %v1534_v18  ;;  %v822_v25 = vand.u32 2147483647, %v1534_v18 }
 0x40d   :  { %1123 = vmatmul.msk.f32.gmra.mxu1 %vm298_vm2, %v872_v20  ;;  %v825_v61 = vor.u32 1.1754944e-38, %v824_v58  ;;  %vm823_vm10 = vcmp.eq.f32.partialorder %v822_v25, 8.507059e+37  ;;  %v443_v20 = vand.u32 2147483648, %v1471_v3 }
 0x411   :  { %v1153_v36 = vpop.eup %1152 }
 0x412   :  { %v1537_v21 = vpop.f32.mrf.mxu1  ;;  %v814_v38 = vmul.f32 %v1153_v36, %v1534_v18  ;;  %vm819_vm7 = vweird.f32 %v1153_v36 }
 0x413   :  { %vm820_vm9 = vmor %vm818_vm8, %vm819_vm7 }
 0x414   :  { %v815_v42 = vsub.f32 1.0, %v814_v38 }
 0x416   :  { %v816_v51 = vmul.f32 %v1153_v36, %v815_v42 }
 0x418   :  { %v817_v55 = vadd.f32 %v1153_v36, %v816_v51 }
 0x41a   :  { %v1539_v22 = vpop.f32.mrf.mxu1  ;;  %v821_v59 = vsel %vm820_vm9, %v1153_v36, %v817_v55 }
 0x41b   :  { %v826_v63 = vsel %vm823_vm10, %v825_v61, %v821_v59 }
 0x422   :  { %v1541_v23 = vpop.f32.mrf.mxu1 }
 0x42a   :  { %v1543_v24 = vpop.f32.mrf.mxu1 }
 0x432   :  { %v1545_v26 = vpop.f32.mrf.mxu1 }
 0x43a   :  { %v953_v27 = vpop.f32.mrf.mxu1 }
 0x442   :  { %v956_v28 = vpop.f32.mrf.mxu1 }
 0x44a   :  { %v959_v29 = vpop.f32.mrf.mxu1 }
 0x452   :  { %v962_v30 = vpop.f32.mrf.mxu1 }
 0x45a   :  { %v965_v33 = vpop.f32.mrf.mxu1 }
 0x462   :  { %v968_v34 = vpop.f32.mrf.mxu1 }
 0x467   :  { %v1548_v35 = vpop.f32.mrf.mxu2 }
 0x468   :  { %1154 = vrcp.f32 %v1548_v35  ;;  %v631_v46 = vand.u32 2147483648, %v1548_v35  ;;  %v629_v49 = vand.u32 2147483647, %v1548_v35  ;;  %vm625_vm4 = vweird.f32 %v1548_v35 }
 0x469   :  { %1156 = vpow2.f32 %v226_v53 }
 0x46a   :  { %v971_v37 = vpop.f32.mrf.mxu1  ;;  %v632_v19 = vor.u32 1.1754944e-38, %v631_v46  ;;  %vm630_vm6 = vcmp.eq.f32.partialorder %v629_v49, 8.507059e+37  ;;  %1158 = vrcp.f32 %v1471_v3 }
 0x46e   :  { %v1155_v39 = vpop.eup %1154 }
 0x46f   :  { %v621_v40 = vmul.f32 %v1155_v39, %v1548_v35  ;;  %vm626_vm3 = vweird.f32 %v1155_v39  ;;  %v1157_v57 = vpop.eup %1156 }
 0x470   :  { %vm627_vm5 = vmor %vm625_vm4, %vm626_vm3  ;;  %v231_v60 = vadd.f32 0.0001, %v1157_v57  ;;  %v1159_v0 = vpop.eup %1158  ;;  %vm644_vm4 = vcmask 523520  }
 0x471   :  { %v622_v44 = vsub.f32 1.0, %v621_v40  ;;  %v433_v5 = vmul.f32 %v1159_v0, %v1471_v3  ;;  %vm438_vm15 = vweird.f32 %v1159_v0 }
 0x472   :  { %v974_v45 = vpop.f32.mrf.mxu1  ;;  %v235_v32 = vmul.f32 0.09534626, %v231_v60  ;;  %vm439_vm2 = vmor %vm437_vm1, %vm438_vm15 }
 0x473   :  { %v623_v47 = vmul.f32 %v1155_v39, %v622_v44  ;;  %v434_v8 = vsub.f32 1.0, %v433_v5 }
 0x475   :  { %v624_v50 = vadd.f32 %v1155_v39, %v623_v47  ;;  %v435_v13 = vmul.f32 %v1159_v0, %v434_v8 }
 0x477   :  { %v628_v52 = vsel %vm627_vm5, %v1155_v39, %v624_v50  ;;  %v436_v17 = vadd.f32 %v1159_v0, %v435_v13  ;;  %vm837_vm5 = vcmask 785920  }
 0x478   :  { %v633_v54 = vsel %vm630_vm6, %v632_v19, %v628_v52  ;;  %vm1030_vm6 = vcmask 1048320  }
 0x479   :  { %636 = vperm.xlu2 %1136, %v633_v54  }
 0x47a   :  { %v977_v56 = vpop.f32.mrf.mxu1 }
 0x481   :  { %829 = vperm.xlu2 %1136, %v826_v63  }
 0x482   :  { %v980_v2 = vpop.f32.mrf.mxu1 }
 0x48a   :  { %v983_v4 = vpop.f32.mrf.mxu1 }
 0x48b   :  { %986 = vmatpush.msra.mxu2 %v983_v4 }
 0x48d   :  { %987 = vmatpush.msra.mxu2 %v980_v2 }
 0x48f   :  { %988 = vmatpush.msra.mxu2 %v977_v56 }
 0x491   :  { %989 = vmatpush.msra.mxu2 %v974_v45 }
 0x493   :  { %990 = vmatpush.msra.mxu2 %v971_v37 }
 0x495   :  { %991 = vmatpush.msra.mxu2 %v968_v34 }
 0x497   :  { %992 = vmatpush.msra.mxu2 %v965_v33 }
 0x499   :  { %993 = vmatpush.msra.mxu2 %v962_v30 }
 0x49b   :  { %994 = vmatpush.msra.mxu2 %v959_v29 }
 0x49d   :  { %995 = vmatpush.msra.mxu2 %v956_v28 }
 0x49f   :  { %996 = vmatpush.msra.mxu2 %v953_v27 }
 0x4a1   :  { %997 = vmatpush.msra.mxu2 %v1545_v26 }
 0x4a3   :  { %998 = vmatpush.msra.mxu2 %v1543_v24 }
 0x4a5   :  { %999 = vmatpush.msra.mxu2 %v1541_v23  ;;  %v444_v23 = vor.u32 1.1754944e-38, %v443_v20 }
 0x4a7   :  { %1000 = vmatpush.msra.mxu2 %v1539_v22  ;;  %v440_v22 = vsel %vm439_vm2, %v1159_v0, %v436_v17 }
 0x4a9   :  { %1001 = vmatpush.msra.mxu2 %v1537_v21  ;;  %v441_v21 = vand.u32 2147483647, %v1471_v3 }
 0x4aa   :  { %1002 = vmatmul.f32.vlgmr.msra.gmra.mxu2 %v235_v32 }
 0x4ab   :  { %vm442_vm3 = vcmp.eq.f32.partialorder %v441_v21, 8.507059e+37 }
 0x4ac   :  { %v445_v24 = vsel %vm442_vm3, %v444_v23, %v440_v22 }
 0x4d3   :  { %v637_v26 = vpop.permute.xlu2 %636 }
 0x4d4   :  { %v639_v27 = vmul.f32 %v637_v26, %v1548_v35 }
 0x4db   :  { %v830_v28 = vpop.permute.xlu2 %829 }
 0x4dc   :  { %v832_v29 = vmul.f32 %v830_v28, %v1534_v18 }
 0x52d   :  { %v1003_v62 = vpop.f32.mrf.mxu2 }
 0x52e   :  { %1160 = vrcp.f32 %v1003_v62  ;;  %v1017_v10 = vand.u32 2147483648, %v1003_v62  ;;  %v1015_v12 = vand.u32 2147483647, %v1003_v62  ;;  %vm1011_vm12 = vweird.f32 %v1003_v62 }
 0x530   :  { %v1018_v14 = vor.u32 1.1754944e-38, %v1017_v10  ;;  %vm1016_vm14 = vcmp.eq.f32.partialorder %v1015_v12, 8.507059e+37 }
 0x534   :  { %v1161_v6 = vpop.eup %1160 }
 0x535   :  { %v1007_v7 = vmul.f32 %v1161_v6, %v1003_v62  ;;  %vm1012_vm11 = vweird.f32 %v1161_v6 }
 0x536   :  { %vm1013_vm13 = vmor %vm1011_vm12, %vm1012_vm11 }
 0x537   :  { %v1008_v9 = vsub.f32 1.0, %v1007_v7 }
 0x539   :  { %v1009_v11 = vmul.f32 %v1161_v6, %v1008_v9 }
 0x53b   :  { %v1010_v1 = vadd.f32 %v1161_v6, %v1009_v11 }
 0x53d   :  { %v1014_v15 = vsel %vm1013_vm13, %v1161_v6, %v1010_v1 }
 0x53e   :  { %v1019_v16 = vsel %vm1016_vm14, %v1018_v14, %v1014_v15 }
 0x53f   :  { %1022 = vperm.xlu2 %1136, %v1019_v16  }
 0x547   :  { %448 = vperm.xlu2 %1136, %v445_v24  }
 0x54f   :  { %641 = vrot.lane.b32.xlu2 %v639_v27, %s1298_s2 }
 0x557   :  { %834 = vrot.lane.b32.xlu2 %v832_v29, %s1299_s3 }
 0x599   :  { %v1023_v30 = vpop.permute.xlu2 %1022 }
 0x59a   :  { %v1025_v31 = vmul.f32 %v1023_v30, %v1003_v62 }
 0x59c   :  { %1027 = vrot.lane.b32.xlu2 %v1025_v31, %s1300_s9 }
 0x5a1   :  { %v449_v33 = vpop.permute.xlu2 %448 }
 0x5a2   :  { %v451_v34 = vmul.f32 %v449_v33, %v1471_v3 }
 0x5a4   :  { %452 = vst.msk [vmem:[#allocation10] sm:$0xff] %vm93_vm0, %v451_v34 }
 0x5a9   :  { %v642_v36 = vpop.permute.xlu2 %641 }
 0x5aa   :  { %645 = vst.msk [vmem:[#allocation10] sm:$0xff] %vm644_vm4, %v642_v36 }
 0x5b1   :  { %v835_v35 = vpop.permute.xlu2 %834 }
 0x5b2   :  { %838 = vst.msk [vmem:[#allocation10] sm:$0xff] %vm837_vm5, %v835_v35 }
 0x5f6   :  { %v1028_v18 = vpop.permute.xlu2 %1027 }
 0x5f7   :  { %1031 = vst.msk [vmem:[#allocation10] sm:$0xff] %vm1030_vm6, %v1028_v18 }
 0x5f8   :  { %1042 = dma.vmem_to_hbm [thread:$0]  %s1038_s11, 128, %s1040_s14, [#allocation4]  }
 0x5f9   :  { %1288 = dma.done.wait [#allocation4], 128  }
 0x5fa   :  { %1289 = vsyncadd [#allocation4], 4294967168 }
 0x5fb   :  { %1047 = vsyncpa [#allocation3], 1 }
 0x5fc   :  { %1048 = vsyncpa [#allocation6], 1 }
 0x5fd   :  { %1049 = vsyncpa [#allocation9], 1 }
 0x5fe   :  { %1050 = vsyncpa [#allocation4], 1 }

</bundles_post_ra>
